<compile_context>
chip_gen: v6e
topology: v6e:2x2x1
jax: 0.10.0
libtpu: 0.0.40
codegen_flags: <defaults>
</compile_context>

<pallas_src>
import numpy as np
import jax
import jax.numpy as jnp
from jax import lax
from jax.experimental import pallas as pl
from jax.experimental.pallas import tpu as pltpu

# Neighbour offsets in the order produced by prepare_diff_filter():
# flattened 3x3 index j in {0,1,2,3,5,6,7,8}, offset = (j // 3 - 1, j % 3 - 1).
_OFFSETS = ((-1, -1), (-1, 0), (-1, 1),
            (0, -1),           (0, 1),
            (1, -1),  (1, 0),  (1, 1))


def _vmem_capacity_bytes():
    """Physical VMEM per TensorCore (conservative fallback if query fails)."""
    try:
        info = pltpu.get_tpu_info()
        for attr in ("vmem_capacity_bytes", "vmem_size_bytes", "vmem_bytes"):
            cap = getattr(info, attr, None)
            if cap:
                return int(cap)
    except Exception:
        pass
    return 64 * 1024 * 1024  # v7x per-TensorCore VMEM (the smallest case)


def _divisors(n):
    return [d for d in range(1, n + 1) if n % d == 0]


def _pick_tiling(ch, h, w, in_isz, out_isz, row_gran, budget_bytes):
    """Pick (c_tile, tile_h) under a VMEM working-set budget.

    Preference: row tiles >= 128 (halo re-read overhead is 16/tile_h), then the
    whole channel range (drops the accumulator RMW), then the largest slab.
    """
    tile_h_cands = sorted({d for d in _divisors(h) if d == h or d % row_gran == 0})
    c_cands = _divisors(ch)

    def footprint(c_t, t_h):
        n_h = h // t_h
        n_c = ch // c_t
        in_blk = c_t * t_h * w * in_isz
        halo = (4 * c_t * row_gran * w * in_isz) if n_h > 1 else 0
        out_blk = 8 * t_h * w * out_isz
        acc = 8 * t_h * w * 4 if n_c > 1 else 0
        temps = 8 * c_t * t_h * w * 4     # f32 working slabs inside the body
        smalls = 16 * t_h * w * 4         # channel-reduced maps / partials
        return 2 * in_blk + halo + 2 * out_blk + acc + temps + smalls

    best = None
    for t_h in tile_h_cands:
        for c_t in c_cands:
            if footprint(c_t, t_h) > budget_bytes:
                continue
            key = (min(t_h, 128), c_t == ch, c_t, t_h)
            if best is None or key > best[0]:
                best = (key, c_t, t_h)
    if best is None:                       # nothing fits the model; go minimal
        return 1, tile_h_cands[0]
    return best[1], best[2]


def _make_kernel(*, c_tile, tile_h, w, n_h, n_c, halo_rows, has_halo,
                 use_identity, out_dtype):
    acc_t = jnp.float32

    def kernel(*refs):
        i = 0
        x_ref = refs[i]; i += 1
        if has_halo:
            top_ref, bot_ref = refs[i], refs[i + 1]
            i += 2
        out_ref = refs[i]; i += 1
        acc_ref = refs[i] if n_c > 1 else None

        hi = pl.program_id(1)      # H row-tile index   ("parallel")
        ci = pl.program_id(2)      # channel slab index ("arbitrary" reduction)

        # TODO(synk): on v6e/v7x keep bf16 inputs in bf16 for the elementwise
        # math (f32 accumulate only); v5e has no bf16 VPU so upcast there.
        xc = x_ref[...].astype(acc_t)                    # (c_tile, tile_h, w)

        # Reflect halo rows: padded row -1 -> row 1, padded row h -> row h-2.
        if has_halo:
            top_row = jnp.where(hi == 0, xc[:, 1, :],
                                top_ref[:, halo_rows - 1, :].astype(acc_t))
            bot_row = jnp.where(hi == n_h - 1, xc[:, tile_h - 2, :],
                                bot_ref[:, 0, :].astype(acc_t))
        else:
            top_row = xc[:, 1, :]
            bot_row = xc[:, tile_h - 2, :]

        lane = lax.broadcasted_iota(jnp.int32, (1, 1, w), 2)
        row = lax.broadcasted_iota(jnp.int32, (1, tile_h, 1), 1)
        at_l0, at_lw = lane == 0, lane == (w - 1)
        at_r0, at_rh = row == 0, row == (tile_h - 1)

        def w_nbrs(t):
            # left[..., j] = t[..., j-1], right[..., j] = t[..., j+1] (reflect).
            rp = pltpu.roll(t, shift=1, axis=2)          # t[..., (j-1) mod w]
            rm = pltpu.roll(t, shift=w - 1, axis=2)      # t[..., (j+1) mod w]
            return jnp.where(at_l0, rm, rp), jnp.where(at_lw, rp, rm)

        def row_up(t, top):        # t shifted one row down (neighbour at r-1)
            return jnp.where(at_r0, top[:, None, :],
                             pltpu.roll(t, shift=1, axis=1))

        def row_dn(t, bot):        # t shifted one row up (neighbour at r+1)
            return jnp.where(at_rh, bot[:, None, :],
                             pltpu.roll(t, shift=tile_h - 1, axis=1))

        if use_identity:
            # out_k = S + shift_k(S) - 2*C_k with S = sum_c x^2 (reflect-shifted
            # exactly like the slab, so the identity holds on boundaries too).
            s_map = jnp.sum(xc * xc, axis=0, keepdims=True)          # (1,th,w)
            s_top = jnp.sum(top_row * top_row, axis=0, keepdims=True)
            s_bot = jnp.sum(bot_row * bot_row, axis=0, keepdims=True)
        else:
            s_map = s_top = s_bot = None

        if n_c > 1:
            @pl.when(ci == 0)
            def _():
                acc_ref[...] = jnp.zeros_like(acc_ref)

        def emit(k, nbr, nbr_s):
            if use_identity:
                res = (s_map[0] + nbr_s[0]) - 2.0 * jnp.sum(xc * nbr, axis=0)
            else:
                d = xc - nbr
                res = jnp.sum(d * d, axis=0)
            if n_c == 1:
                out_ref[k] = res.astype(out_dtype)
            else:
                acc_ref[k] += res

        # Order must match prepare_diff_filter / _OFFSETS.
        # --- dy = -1 (row above) -> directions 0,1,2 ---
        xs = row_up(xc, top_row)
        ss = row_up(s_map, s_top) if use_identity else None
        xl, xr = w_nbrs(xs)
        sl, sr = w_nbrs(ss) if use_identity else (None, None)
        emit(0, xl, sl); emit(1, xs, ss); emit(2, xr, sr)

        # --- dy = 0 -> directions 3,4 ---
        xl, xr = w_nbrs(xc)
        sl, sr = w_nbrs(s_map) if use_identity else (None, None)
        emit(3, xl, sl); emit(4, xr, sr)

        # --- dy = +1 (row below) -> directions 5,6,7 ---
        xs = row_dn(xc, bot_row)
        ss = row_dn(s_map, s_bot) if use_identity else None
        xl, xr = w_nbrs(xs)
        sl, sr = w_nbrs(ss) if use_identity else (None, None)
        emit(5, xl, sl); emit(6, xs, ss); emit(7, xr, sr)

        if n_c > 1:
            @pl.when(ci == n_c - 1)
            def _():
                out_ref[...] = acc_ref[...].astype(out_dtype)

    return kernel


def difference_filter(x, *, tile_h=None, c_tile=None, use_identity=None):
    """x: (b, ch, h, w) -> (b, 8, h, w); matches differenceFilter(ch).forward."""
    b, ch, h, w = x.shape
    if h < 2 or w < 2:
        raise ValueError("reflect padding requires h >= 2 and w >= 2")
    out_dtype = x.dtype
    isz = jnp.dtype(x.dtype).itemsize
    row_gran = max(8, 32 // isz)          # 8 (4B), 16 (2B), 32 (1B) sublanes
    halo_rows = row_gran

    # Per-generation VMEM budget: v5e/v6e have 128 MiB, v7x 64 MiB per TC.
    vmem_cap = _vmem_capacity_bytes()
    if vmem_cap >= 100 * 1024 * 1024:
        vmem_limit = 96 * 1024 * 1024
    else:
        vmem_limit = 44 * 1024 * 1024
    budget = (vmem_limit * 6) // 10       # headroom for compiler temporaries

    auto_c, auto_h = _pick_tiling(ch, h, w, isz, isz, row_gran, budget)
    if c_tile is None:
        c_tile = auto_c
    if tile_h is None:
        tile_h = auto_h

    if ch % c_tile != 0:
        raise ValueError(f"c_tile={c_tile} must divide ch={ch}")
    if h % tile_h != 0:
        raise ValueError(f"tile_h={tile_h} must divide h={h}")
    n_c = ch // c_tile
    n_h = h // tile_h
    if n_h > 1 and tile_h % row_gran != 0:
        raise ValueError(f"tile_h must be a multiple of {row_gran} when h is split")
    has_halo = n_h > 1
    if use_identity is None:
        use_identity = c_tile >= 8        # identity formulation pays off here

    grid = (b, n_h, n_c)

    def x_map(bi, hi, ci):
        return (bi, ci, hi, 0)

    in_specs = [pl.BlockSpec((None, c_tile, tile_h, w), x_map)]
    args = [x]

    if has_halo:
        thb = tile_h // halo_rows         # row tile measured in halo blocks
        nhb = h // halo_rows              # number of halo blocks in the image

        # Halo-row windows just above / below the current row tile (clamped at
        # the image boundary, where the kernel uses the in-tile reflect row).
        def top_map(bi, hi, ci):
            return (bi, ci, jnp.maximum(hi * thb - 1, 0), 0)

        def bot_map(bi, hi, ci):
            return (bi, ci, jnp.minimum(hi * thb + thb, nhb - 1), 0)

        in_specs += [pl.BlockSpec((None, c_tile, halo_rows, w), top_map),
                     pl.BlockSpec((None, c_tile, halo_rows, w), bot_map)]
        args += [x, x]

    # TODO(synk): for w far below 128 lanes, fold rows onto the lane axis (flat
    # lane-dense output slab / explicit W-tiling) so stores are unmasked vst.
    out_spec = pl.BlockSpec((None, 8, tile_h, w), lambda bi, hi, ci: (bi, 0, hi, 0))

    scratch = []
    if n_c > 1:
        scratch.append(pltpu.VMEM((8, tile_h, w), jnp.float32))

    kernel = _make_kernel(c_tile=c_tile, tile_h=tile_h, w=w, n_h=n_h, n_c=n_c,
                          halo_rows=halo_rows, has_halo=has_halo,
                          use_identity=use_identity, out_dtype=out_dtype)

    return pl.pallas_call(
        kernel,
        out_shape=jax.ShapeDtypeStruct((b, 8, h, w), out_dtype),
        grid_spec=pltpu.PrefetchScalarGridSpec(
            num_scalar_prefetch=0,
            grid=grid,
            in_specs=in_specs,
            out_specs=out_spec,
            scratch_shapes=scratch),
        compiler_params=pltpu.CompilerParams(
            dimension_semantics=("parallel", "parallel", "arbitrary"),
            vmem_limit_bytes=vmem_limit),
    )(*args)


def _reference(x):
    """Pure-JAX reference reproducing the PyTorch forward."""
    b, ch, h, w = x.shape
    xpad = jnp.pad(x, ((0, 0), (0, 0), (1, 1), (1, 1)), mode="reflect")
    center = xpad[:, :, 1:1 + h, 1:1 + w]
    outs = []
    for dy, dx in _OFFSETS:
        nbr = xpad[:, :, 1 + dy:1 + dy + h, 1 + dx:1 + dx + w]
        outs.append(jnp.sum((center - nbr) ** 2, axis=1))
    return jnp.stack(outs, axis=1)


if __name__ == "__main__":
    k0, k1 = jax.random.split(jax.random.PRNGKey(0))

    # Case 1: small tensor, auto tiling (single row tile, whole channel slab,
    # n_c == 1 specialization, direct squared-difference path).
    b, ch, h, w = 2, 4, 16, 16
    x = jax.random.normal(k0, (b, ch, h, w), dtype=jnp.float32)
    ref = jax.block_until_ready(_reference(x))

    out = jax.block_until_ready(difference_filter(x))
    assert out.shape == (b, 8, h, w), out.shape
    np.testing.assert_allclose(np.asarray(out), np.asarray(ref),
                               rtol=1e-4, atol=1e-4)

    # Case 2: forced tiling that exercises the reflect halo rows and the
    # channel-reduction accumulator (still the direct path, c_tile < 8).
    out = jax.block_until_ready(difference_filter(x, tile_h=8, c_tile=2))
    np.testing.assert_allclose(np.asarray(out), np.asarray(ref),
                               rtol=1e-4, atol=1e-4)

    # Case 3: more channels -> auto path picks the whole-channel slab and the
    # S + shift(S) - 2C identity formulation (n_c == 1, no halo).
    x2 = jax.random.normal(k1, (1, 16, 16, 16), dtype=jnp.float32)
    ref2 = jax.block_until_ready(_reference(x2))
    out2 = jax.block_until_ready(difference_filter(x2))
    np.testing.assert_allclose(np.asarray(out2), np.asarray(ref2),
                               rtol=1e-4, atol=1e-4)

    # Case 4: identity formulation together with halos and the accumulator.
    out2b = jax.block_until_ready(difference_filter(x2, tile_h=8, c_tile=8))
    np.testing.assert_allclose(np.asarray(out2b), np.asarray(ref2),
                               rtol=1e-4, atol=1e-4)

    print("KERNEL_OK")
</pallas_src>

<mosaic_0001>
module attributes {stable_mosaic.version = 11 : i64} {
  func.func @kernel(%arg0: i32, %arg1: i32, %arg2: i32, %arg3: memref<1x4x16x16xf32, #tpu.memory_space<vmem>>, %arg4: memref<1x8x16x16xf32, #tpu.memory_space<vmem>>) attributes {dimension_semantics = [#tpu.dimension_semantics<parallel>, #tpu.dimension_semantics<parallel>, #tpu.dimension_semantics<arbitrary>], iteration_bounds = array<i64: 2, 1, 1>, scalar_prefetch = 0 : i64, scratch_operands = 0 : i64, tpu.core_type = #tpu.core_type<tc>, window_params = [{transform_indices = @transform_0, window_bounds = array<i64: 1, 4, 16, 16>}, {transform_indices = @transform_1, window_bounds = array<i64: 1, 8, 16, 16>}]} {
    %c0 = arith.constant 0 : index
    %c0_0 = arith.constant 0 : index
    %c0_1 = arith.constant 0 : index
    %c0_2 = arith.constant 0 : index
    %0 = vector.load %arg3[%c0, %c0_0, %c0_1, %c0_2] : memref<1x4x16x16xf32, #tpu.memory_space<vmem>>, vector<1x4x16x16xf32>
    %1 = vector.shape_cast %0 : vector<1x4x16x16xf32> to vector<4x16x16xf32>
    %2 = vector.extract_strided_slice %1 {offsets = [0, 1, 0], sizes = [4, 1, 16], strides = [1, 1, 1]} : vector<4x16x16xf32> to vector<4x1x16xf32>
    %3 = vector.shape_cast %2 : vector<4x1x16xf32> to vector<4x16xf32>
    %4 = vector.extract_strided_slice %1 {offsets = [0, 14, 0], sizes = [4, 1, 16], strides = [1, 1, 1]} : vector<4x16x16xf32> to vector<4x1x16xf32>
    %5 = vector.shape_cast %4 : vector<4x1x16xf32> to vector<4x16xf32>
    %6 = tpu.iota {dimensions = array<i32: 2>} : vector<1x1x16xi32>
    %7 = tpu.iota {dimensions = array<i32: 1>} : vector<1x16x1xi32>
    %c0_i32 = arith.constant 0 : i32
    %8 = vector.broadcast %c0_i32 : i32 to vector<1x1x16xi32>
    %9 = arith.cmpi eq, %6, %8 : vector<1x1x16xi32>
    %c15_i32 = arith.constant 15 : i32
    %10 = vector.broadcast %c15_i32 : i32 to vector<1x1x16xi32>
    %11 = arith.cmpi eq, %6, %10 : vector<1x1x16xi32>
    %c0_i32_3 = arith.constant 0 : i32
    %12 = vector.broadcast %c0_i32_3 : i32 to vector<1x16x1xi32>
    %13 = arith.cmpi eq, %7, %12 : vector<1x16x1xi32>
    %c15_i32_4 = arith.constant 15 : i32
    %14 = vector.broadcast %c15_i32_4 : i32 to vector<1x16x1xi32>
    %15 = arith.cmpi eq, %7, %14 : vector<1x16x1xi32>
    %16 = vector.shape_cast %3 : vector<4x16xf32> to vector<4x1x16xf32>
    %c1_i32 = arith.constant 1 : i32
    %17 = tpu.dynamic_rotate %1 by %c1_i32 dim 1 : vector<4x16x16xf32>, i32 -> vector<4x16x16xf32>
    %18 = vector.shape_cast %13 : vector<1x16x1xi1> to vector<1x16x1xi1>
    %19 = vector.broadcast %18 : vector<1x16x1xi1> to vector<4x16x16xi1>
    %20 = vector.shape_cast %16 : vector<4x1x16xf32> to vector<4x1x16xf32>
    %21 = vector.broadcast %20 : vector<4x1x16xf32> to vector<4x16x16xf32>
    %22 = arith.select %19, %21, %17 : vector<4x16x16xi1>, vector<4x16x16xf32>
    %c1_i32_5 = arith.constant 1 : i32
    %23 = tpu.dynamic_rotate %22 by %c1_i32_5 dim 2 : vector<4x16x16xf32>, i32 -> vector<4x16x16xf32>
    %c15_i32_6 = arith.constant 15 : i32
    %24 = tpu.dynamic_rotate %22 by %c15_i32_6 dim 2 : vector<4x16x16xf32>, i32 -> vector<4x16x16xf32>
    %25 = vector.shape_cast %9 : vector<1x1x16xi1> to vector<1x1x16xi1>
    %26 = vector.broadcast %25 : vector<1x1x16xi1> to vector<4x16x16xi1>
    %27 = arith.select %26, %24, %23 : vector<4x16x16xi1>, vector<4x16x16xf32>
    %28 = vector.shape_cast %11 : vector<1x1x16xi1> to vector<1x1x16xi1>
    %29 = vector.broadcast %28 : vector<1x1x16xi1> to vector<4x16x16xi1>
    %30 = arith.select %29, %23, %24 : vector<4x16x16xi1>, vector<4x16x16xf32>
    %31 = arith.subf %1, %27 : vector<4x16x16xf32>
    %32 = arith.mulf %31, %31 : vector<4x16x16xf32>
    %cst = arith.constant dense<0.000000e+00> : vector<16x16xf32>
    %33 = vector.multi_reduction <add>, %32, %cst [0] : vector<4x16x16xf32> to vector<16x16xf32>
    %c0_7 = arith.constant 0 : index
    %c0_8 = arith.constant 0 : index
    %c0_9 = arith.constant 0 : index
    %c0_10 = arith.constant 0 : index
    %34 = vector.load %arg4[%c0_7, %c0_8, %c0_9, %c0_10] : memref<1x8x16x16xf32, #tpu.memory_space<vmem>>, vector<1x1x16x16xf32>
    %35 = vector.shape_cast %34 : vector<1x1x16x16xf32> to vector<16x16xf32>
    %36 = vector.shape_cast %33 : vector<16x16xf32> to vector<1x1x16x16xf32>
    tpu.vector_store %arg4[%c0_7, %c0_8, %c0_9, %c0_10], %36 {strides = array<i32>} : memref<1x8x16x16xf32, #tpu.memory_space<vmem>>, vector<1x1x16x16xf32>,
    %37 = arith.subf %1, %22 : vector<4x16x16xf32>
    %38 = arith.mulf %37, %37 : vector<4x16x16xf32>
    %cst_11 = arith.constant dense<0.000000e+00> : vector<16x16xf32>
    %39 = vector.multi_reduction <add>, %38, %cst_11 [0] : vector<4x16x16xf32> to vector<16x16xf32>
    %c0_12 = arith.constant 0 : index
    %c1 = arith.constant 1 : index
    %c0_13 = arith.constant 0 : index
    %c0_14 = arith.constant 0 : index
    %40 = vector.load %arg4[%c0_12, %c1, %c0_13, %c0_14] : memref<1x8x16x16xf32, #tpu.memory_space<vmem>>, vector<1x1x16x16xf32>
    %41 = vector.shape_cast %40 : vector<1x1x16x16xf32> to vector<16x16xf32>
    %42 = vector.shape_cast %39 : vector<16x16xf32> to vector<1x1x16x16xf32>
    tpu.vector_store %arg4[%c0_12, %c1, %c0_13, %c0_14], %42 {strides = array<i32>} : memref<1x8x16x16xf32, #tpu.memory_space<vmem>>, vector<1x1x16x16xf32>,
    %43 = arith.subf %1, %30 : vector<4x16x16xf32>
    %44 = arith.mulf %43, %43 : vector<4x16x16xf32>
    %cst_15 = arith.constant dense<0.000000e+00> : vector<16x16xf32>
    %45 = vector.multi_reduction <add>, %44, %cst_15 [0] : vector<4x16x16xf32> to vector<16x16xf32>
    %c0_16 = arith.constant 0 : index
    %c2 = arith.constant 2 : index
    %c0_17 = arith.constant 0 : index
    %c0_18 = arith.constant 0 : index
    %46 = vector.load %arg4[%c0_16, %c2, %c0_17, %c0_18] : memref<1x8x16x16xf32, #tpu.memory_space<vmem>>, vector<1x1x16x16xf32>
    %47 = vector.shape_cast %46 : vector<1x1x16x16xf32> to vector<16x16xf32>
    %48 = vector.shape_cast %45 : vector<16x16xf32> to vector<1x1x16x16xf32>
    tpu.vector_store %arg4[%c0_16, %c2, %c0_17, %c0_18], %48 {strides = array<i32>} : memref<1x8x16x16xf32, #tpu.memory_space<vmem>>, vector<1x1x16x16xf32>,
    %c1_i32_19 = arith.constant 1 : i32
    %49 = tpu.dynamic_rotate %1 by %c1_i32_19 dim 2 : vector<4x16x16xf32>, i32 -> vector<4x16x16xf32>
    %c15_i32_20 = arith.constant 15 : i32
    %50 = tpu.dynamic_rotate %1 by %c15_i32_20 dim 2 : vector<4x16x16xf32>, i32 -> vector<4x16x16xf32>
    %51 = vector.shape_cast %9 : vector<1x1x16xi1> to vector<1x1x16xi1>
    %52 = vector.broadcast %51 : vector<1x1x16xi1> to vector<4x16x16xi1>
    %53 = arith.select %52, %50, %49 : vector<4x16x16xi1>, vector<4x16x16xf32>
    %54 = vector.shape_cast %11 : vector<1x1x16xi1> to vector<1x1x16xi1>
    %55 = vector.broadcast %54 : vector<1x1x16xi1> to vector<4x16x16xi1>
    %56 = arith.select %55, %49, %50 : vector<4x16x16xi1>, vector<4x16x16xf32>
    %57 = arith.subf %1, %53 : vector<4x16x16xf32>
    %58 = arith.mulf %57, %57 : vector<4x16x16xf32>
    %cst_21 = arith.constant dense<0.000000e+00> : vector<16x16xf32>
    %59 = vector.multi_reduction <add>, %58, %cst_21 [0] : vector<4x16x16xf32> to vector<16x16xf32>
    %c0_22 = arith.constant 0 : index
    %c3 = arith.constant 3 : index
    %c0_23 = arith.constant 0 : index
    %c0_24 = arith.constant 0 : index
    %60 = vector.load %arg4[%c0_22, %c3, %c0_23, %c0_24] : memref<1x8x16x16xf32, #tpu.memory_space<vmem>>, vector<1x1x16x16xf32>
    %61 = vector.shape_cast %60 : vector<1x1x16x16xf32> to vector<16x16xf32>
    %62 = vector.shape_cast %59 : vector<16x16xf32> to vector<1x1x16x16xf32>
    tpu.vector_store %arg4[%c0_22, %c3, %c0_23, %c0_24], %62 {strides = array<i32>} : memref<1x8x16x16xf32, #tpu.memory_space<vmem>>, vector<1x1x16x16xf32>,
    %63 = arith.subf %1, %56 : vector<4x16x16xf32>
    %64 = arith.mulf %63, %63 : vector<4x16x16xf32>
    %cst_25 = arith.constant dense<0.000000e+00> : vector<16x16xf32>
    %65 = vector.multi_reduction <add>, %64, %cst_25 [0] : vector<4x16x16xf32> to vector<16x16xf32>
    %c0_26 = arith.constant 0 : index
    %c4 = arith.constant 4 : index
    %c0_27 = arith.constant 0 : index
    %c0_28 = arith.constant 0 : index
    %66 = vector.load %arg4[%c0_26, %c4, %c0_27, %c0_28] : memref<1x8x16x16xf32, #tpu.memory_space<vmem>>, vector<1x1x16x16xf32>
    %67 = vector.shape_cast %66 : vector<1x1x16x16xf32> to vector<16x16xf32>
    %68 = vector.shape_cast %65 : vector<16x16xf32> to vector<1x1x16x16xf32>
    tpu.vector_store %arg4[%c0_26, %c4, %c0_27, %c0_28], %68 {strides = array<i32>} : memref<1x8x16x16xf32, #tpu.memory_space<vmem>>, vector<1x1x16x16xf32>,
    %69 = vector.shape_cast %5 : vector<4x16xf32> to vector<4x1x16xf32>
    %c15_i32_29 = arith.constant 15 : i32
    %70 = tpu.dynamic_rotate %1 by %c15_i32_29 dim 1 : vector<4x16x16xf32>, i32 -> vector<4x16x16xf32>
    %71 = vector.shape_cast %15 : vector<1x16x1xi1> to vector<1x16x1xi1>
    %72 = vector.broadcast %71 : vector<1x16x1xi1> to vector<4x16x16xi1>
    %73 = vector.shape_cast %69 : vector<4x1x16xf32> to vector<4x1x16xf32>
    %74 = vector.broadcast %73 : vector<4x1x16xf32> to vector<4x16x16xf32>
    %75 = arith.select %72, %74, %70 : vector<4x16x16xi1>, vector<4x16x16xf32>
    %c1_i32_30 = arith.constant 1 : i32
    %76 = tpu.dynamic_rotate %75 by %c1_i32_30 dim 2 : vector<4x16x16xf32>, i32 -> vector<4x16x16xf32>
    %c15_i32_31 = arith.constant 15 : i32
    %77 = tpu.dynamic_rotate %75 by %c15_i32_31 dim 2 : vector<4x16x16xf32>, i32 -> vector<4x16x16xf32>
    %78 = vector.shape_cast %9 : vector<1x1x16xi1> to vector<1x1x16xi1>
    %79 = vector.broadcast %78 : vector<1x1x16xi1> to vector<4x16x16xi1>
    %80 = arith.select %79, %77, %76 : vector<4x16x16xi1>, vector<4x16x16xf32>
    %81 = vector.shape_cast %11 : vector<1x1x16xi1> to vector<1x1x16xi1>
    %82 = vector.broadcast %81 : vector<1x1x16xi1> to vector<4x16x16xi1>
    %83 = arith.select %82, %76, %77 : vector<4x16x16xi1>, vector<4x16x16xf32>
    %84 = arith.subf %1, %80 : vector<4x16x16xf32>
    %85 = arith.mulf %84, %84 : vector<4x16x16xf32>
    %cst_32 = arith.constant dense<0.000000e+00> : vector<16x16xf32>
    %86 = vector.multi_reduction <add>, %85, %cst_32 [0] : vector<4x16x16xf32> to vector<16x16xf32>
    %c0_33 = arith.constant 0 : index
    %c5 = arith.constant 5 : index
    %c0_34 = arith.constant 0 : index
    %c0_35 = arith.constant 0 : index
    %87 = vector.load %arg4[%c0_33, %c5, %c0_34, %c0_35] : memref<1x8x16x16xf32, #tpu.memory_space<vmem>>, vector<1x1x16x16xf32>
    %88 = vector.shape_cast %87 : vector<1x1x16x16xf32> to vector<16x16xf32>
    %89 = vector.shape_cast %86 : vector<16x16xf32> to vector<1x1x16x16xf32>
    tpu.vector_store %arg4[%c0_33, %c5, %c0_34, %c0_35], %89 {strides = array<i32>} : memref<1x8x16x16xf32, #tpu.memory_space<vmem>>, vector<1x1x16x16xf32>,
    %90 = arith.subf %1, %75 : vector<4x16x16xf32>
    %91 = arith.mulf %90, %90 : vector<4x16x16xf32>
    %cst_36 = arith.constant dense<0.000000e+00> : vector<16x16xf32>
    %92 = vector.multi_reduction <add>, %91, %cst_36 [0] : vector<4x16x16xf32> to vector<16x16xf32>
    %c0_37 = arith.constant 0 : index
    %c6 = arith.constant 6 : index
    %c0_38 = arith.constant 0 : index
    %c0_39 = arith.constant 0 : index
    %93 = vector.load %arg4[%c0_37, %c6, %c0_38, %c0_39] : memref<1x8x16x16xf32, #tpu.memory_space<vmem>>, vector<1x1x16x16xf32>
    %94 = vector.shape_cast %93 : vector<1x1x16x16xf32> to vector<16x16xf32>
    %95 = vector.shape_cast %92 : vector<16x16xf32> to vector<1x1x16x16xf32>
    tpu.vector_store %arg4[%c0_37, %c6, %c0_38, %c0_39], %95 {strides = array<i32>} : memref<1x8x16x16xf32, #tpu.memory_space<vmem>>, vector<1x1x16x16xf32>,
    %96 = arith.subf %1, %83 : vector<4x16x16xf32>
    %97 = arith.mulf %96, %96 : vector<4x16x16xf32>
    %cst_40 = arith.constant dense<0.000000e+00> : vector<16x16xf32>
    %98 = vector.multi_reduction <add>, %97, %cst_40 [0] : vector<4x16x16xf32> to vector<16x16xf32>
    %c0_41 = arith.constant 0 : index
    %c7 = arith.constant 7 : index
    %c0_42 = arith.constant 0 : index
    %c0_43 = arith.constant 0 : index
    %99 = vector.load %arg4[%c0_41, %c7, %c0_42, %c0_43] : memref<1x8x16x16xf32, #tpu.memory_space<vmem>>, vector<1x1x16x16xf32>
    %100 = vector.shape_cast %99 : vector<1x1x16x16xf32> to vector<16x16xf32>
    %101 = vector.shape_cast %98 : vector<16x16xf32> to vector<1x1x16x16xf32>
    tpu.vector_store %arg4[%c0_41, %c7, %c0_42, %c0_43], %101 {strides = array<i32>} : memref<1x8x16x16xf32, #tpu.memory_space<vmem>>, vector<1x1x16x16xf32>,
    return
  }
  func.func @transform_0(%arg0: i32, %arg1: i32, %arg2: i32) -> (i32, i32, i32, i32) {
    %c0_i32 = arith.constant 0 : i32
    %c0_i32_0 = arith.constant 0 : i32
    return %arg0, %arg2, %arg1, %c0_i32 : i32, i32, i32, i32
  }
  func.func @transform_1(%arg0: i32, %arg1: i32, %arg2: i32) -> (i32, i32, i32, i32) {
    %c0_i32 = arith.constant 0 : i32
    %c0_i32_0 = arith.constant 0 : i32
    %c0_i32_1 = arith.constant 0 : i32
    return %arg0, %c0_i32, %arg1, %c0_i32_0 : i32, i32, i32, i32
  }
}

</mosaic_0001>

<bundles_post_ra>
// kernel: tpu_custom_call.1
= control target key start
LH: loop header
LB: loop body
LE: loop exit
PB: predicated region body
PF: predicated region fallthrough
CT: control target
= control target key end

     0   :  { %6 = vsyncpa [#allocation3], 0  ;;  %s2061_s0 = inlined_call_operand.hbm [shape: f32[2,4,16,16], index: 0, kind: input, shape index: {}]   ;;  %s2062_s1 = inlined_call_operand.hbm [shape: f32[2,8,16,16], index: 1, kind: output, shape index: {}]  }
   0x1   :  { %8 = vsyncpa [#allocation3 + $0x1], 0 }
   0x2   :  { %9 = vsyncpa [#allocation4], 0 }
   0x3   :  { %11 = vsyncpa [#allocation4 + $0x1], 0  ;;  %s1243_s6 = smov 0   ;;  %s1245_s7 = smov 0  }
   0x4   :  { %s1247_s8 = smov 0   ;;  %s1249_s9 = smov 0  }
   0x5   :  { %s1251_s10 = smov 0   ;;  %s1253_s11 = smov 0  }
   0x6 LB: > { %s1011_s12 = sadd.s32 4294967295, %s1222_s11   ;;  %s1012_s13 = sadd.s32 4294967294, %s1222_s11   ;;  %s1222_s11 = sphi %s1253_s11, %s17_s11   ;;  %s1218_s10 = sphi %s1251_s10, %s2073_s10   ;;  %s1214_s9 = sphi %s1249_s9, %s2072_s9   ;;  %s1210_s8 = sphi %s1247_s8, %s2071_s8   ;;  %s1206_s7 = sphi %s1245_s7, %s2070_s7   ;;  %s1202_s6 = sphi %s1243_s6, %s2069_s6  }
   0x7   : > { %s36_s14 = sadd.s32 1, %s1218_s10  ;;  %s47_s15 = sadd.s32 1, %s1210_s8 }
   0x8   : > { %p38_p0 = scmp.ge.s32.totalorder %s36_s14, 2  ;;  %p54_p1 = scmp.ne.s32.totalorder %s1210_s8, %s1206_s7 }
   0x9   : > { %p55_p2 = scmp.eq.s32.totalorder %s1222_s11, 0  ;;  %p60_p3 = scmp.ne.s32.totalorder %s1206_s7, %s1202_s6 }
   0xa   : > { %s2075_s14 = smov (%p38_p0, %s36_s14), 0  ;;  %p61_p5 = scmp.eq.s32.totalorder %s1011_s12, 0 }
   0xb   : > { %p1284_p4 = por %p55_p2, %p54_p1  ;;  %s40_s17 = ssub.s32 %s1218_s10, %s2075_s14 }
   0xc   : > { %p86_p6 = scmp.eq.s32.totalorder %s1011_s12, 1  ;;  %p45_p7 = scmp.eq.s32.totalorder %s40_s17, 0 }
   0xd   : > { %p1290_p8 = por %p61_p5, %p60_p3  ;;  %p92_p10 = scmp.eq.s32.totalorder %s1012_s13, 1 }
   0xe   : > { %p1294_p9 = por %p86_p6, %p54_p1  ;;  %p1054_p13 = scmp.lt.s32.totalorder %s1222_s11, 2 }
   0xf   : > { %s1299_s20 = scalar_select %p45_p7, %s1210_s8, %s47_s15  }
  0x10   : > { %p1301_p11 = por %p92_p10, %p60_p3  ;;  %s112_s22 = sand.u32 1, %s1210_s8  }
  0x11   : > { %s1015_s23 = sshll.u32 %s112_s22, 6  ;;  %s1040_s24 = sshll.u32 %s1218_s10, 10 }
  0x12   : > { %s127_s27 = scalar_lea.hbm %s2061_s0, %s1040_s24  ;;  %s116_s28 = scalar_lea.vmem [#allocation2], %s1015_s23 }
  0x13   : > { %s128_s29 = sshll.u32 %s116_s28, 4  ;;  %p1314_p0 = pnand %p1054_p13, %p1284_p4  ;;  %s129_s29 = int_to_ptr.vmem [resolvable:$true] %s128_s29 }
  0x14   : > { %p1018_p1 = scmp.ge.s32.totalorder %s1222_s11, 1  ;;  %s113_s2 = scalar_lea.sflag [#allocation3], %s112_s22 }
  0x15   : > { %p1116_p2 = pneg %p1314_p0  ;;  %s1127_s3 = scalar_lea.vmem %s129_s29, 1024 }
  0x16   : > { %p1128_p3 = scmp.ne.s32.totalorder %s129_s29, %s1127_s3  ;;  %s1224_s4 = smov [#allocation2]  }
  0x17   : > { %s1132_s5 = sshll.u32 %s1224_s4, 4  ;;  %s1133_s5 = int_to_ptr.vmem [resolvable:$false] %s1132_s5 }
  0x18   : > { %p1130_p5 = pnand %p1128_p3, %p1116_p2  ;;  %s1134_s12 = scalar_lea.vmem %s1133_s5, 2048 }
  0x19   : > { %p1135_p7 = scmp.lt.s32.totalorder %s129_s29, %s1133_s5  ;;  %p1136_p10 = scmp.lt.s32.totalorder %s1134_s12, %s1127_s3 }
  0x1a   : > { %p1131_p6 = pneg %p1130_p5 }
  0x1b   : > { %p1137_p12 = por %p1136_p10, %p1135_p7 }
  0x1d   : > { %p1138_p4 = pnand %p1137_p12, %p1131_p6 }
  0x1f   : > { %1141 = shalt.err (!%p1138_p4)
}
  0x20   : > { %s1225_s13 = smov 128   ;;  %s1226_s15 = smov 8  }
  0x21   : > { %1049 = dma.hbm_to_vmem [thread:$0]  (!%p1314_p0), %s127_s27, 1024, %s129_s29, %s113_s2, %s1225_s13, %s1225_s13, %s1226_s15  }
  0x22   : > { %p136_p13 = scmp.lt.s32.totalorder %s1222_s11, 3 }
  0x24   : > { %p137_p2 = pnand %p1018_p1, %p136_p13 }
  0x25   : > { %s1327_s16 = sand.u32 (!%p137_p2), 1, %s1206_s7  }
  0x26   : > { %140 = sbr.rel (%p137_p2) target bundleno = 541 (0x21d), region = 24  ;;  %s1019_s17 = sshll.u32 (!%p137_p2), %s1327_s16, 6 }
  0x27   : > { %s143_s22 = scalar_lea.sflag (!%p137_p2), [#allocation3], %s1327_s16  ;;  %s1331_s23 = scalar_lea.vmem (!%p137_p2), [#allocation2], %s1019_s17 }
  0x2b   : > { %1193 = dma.done.wait (%p1290_p8), %s143_s22, 1024  }
  0x2c   : > { %1195 = vsyncadd (%p1290_p8), %s143_s22, 4294966272  ;;  %v176_v0 = vlaneseq  ;;  %v1351_v5 = vld [vmem:[%s1331_s23 + $0x8] sm:$0xff]  ;;  %v1354_v6 = vld [vmem:[%s1331_s23] sm:$0xff]  ;;  %s1227_s18 = smov 16   ;;  %vm373_vm4 = vcmask 130048   ;;  %s1020_s24 = sshll.u32 %s1327_s16, 7 }
  0x2d   : > { %v1357_v7 = vld [vmem:[%s1331_s23 + $0x10] sm:$0xff]  ;;  %459 = vrot.lane.b32.xlu1 %v1351_v5, %s1227_s18  ;;  %456 = vrot.lane.b32.xlu0 %v1354_v6, %s1227_s18  ;;  %v1367_v8 = vld [vmem:[%s1331_s23 + $0x18] sm:$0xff]  ;;  %v187_v10 = vrot.slane %v1354_v6, 7  ;;  %v191_v11 = vrot.slane %v1351_v5, 7  ;;  %v642_v15 = vrot.slane %v1354_v6, 1  ;;  %v646_v16 = vrot.slane %v1351_v5, 1 }
  0x2e   : > { %v1338_v1 = vshrl.u32 %v176_v0, 7  ;;  %v188_v9 = vrot.slane %v1357_v7, 7  ;;  %v192_v13 = vrot.slane %v1367_v8, 7  ;;  %v643_v20 = vrot.slane %v1357_v7, 1  ;;  %v1438_v42 = vld [vmem:[%s1331_s23 + $0x20] sm:$0xff]  ;;  %v1441_v43 = vld [vmem:[%s1331_s23 + $0x28] sm:$0xff] }
  0x2f   : > { %v647_v28 = vrot.slane %v1367_v8, 1  ;;  %v189_v53 = vrot.slane %v1438_v42, 7  ;;  %v193_v54 = vrot.slane %v1441_v43, 7  ;;  %v644_v57 = vrot.slane %v1438_v42, 1  ;;  %v1478_v63 = vld [vmem:[%s1331_s23 + $0x30] sm:$0xff]  ;;  %s1564_s25 = scalar_lea.vmem [#allocation5], %s1020_s24 }
  0x30   : > { %v1341_v2 = vsub.s32 1, %v1338_v1  ;;  %v1344_v3 = vadd.s32 8, %v1338_v1  ;;  %vm195_vm0 = vcmp.lt.s32.totalorder %v1338_v1, 1  ;;  %v1348_v4 = vsub.s32 6, %v1338_v1  ;;  %s1228_s26 = smov 127   ;;  %s1229_s27 = smov 113  }
  0x31   : > { %vm183_vm1 = vcmp.eq.s32.totalorder %v1338_v1, 0  ;;  %vm650_vm3 = vcmp.lt.s32.totalorder %v1338_v1, 7  ;;  %v1381_v17 = vsel %vm195_vm0, %v187_v10, %v191_v11  ;;  %v200_v18 = vsel %vm195_vm0, %v191_v11, %v187_v10  ;;  %s1041_s28 = sshll.u32 %s1214_s9, 11  ;;  %s922_s29 = sshll.u32 %s1564_s25, 4  ;;  %s2009_s29 = int_to_ptr.vmem [resolvable:$true] %s922_s29 }
  0x32   : > { %vm186_vm2 = vcmp.eq.s32.totalorder %v1344_v3, 15  ;;  %v215_v12 = vrot.slane %v1357_v7, %v1341_v2  ;;  %v211_v14 = vrot.slane %v1354_v6, %v1341_v2  ;;  %v666_v19 = vrot.slane %v1351_v5, %v1348_v4  ;;  %236 = vrot.lane.b32.xlu0 %v1381_v17, %s1227_s18  ;;  %s2007_s2 = scalar_lea.hbm %s2062_s1, %s1041_s28  ;;  %s907_s3 = scalar_lea.sflag [#allocation4], %s1327_s16 }
  0x33   : > { %v1390_v21 = vsel %vm195_vm0, %v188_v9, %v192_v13  ;;  %v391_v22 = vsub.f32 %v1351_v5, %v1381_v17  ;;  %v201_v23 = vsel %vm195_vm0, %v192_v13, %v188_v9  ;;  %v655_v31 = vsel %vm650_vm3, %v646_v16, %v642_v15  ;;  %v1489_v13 = vld [vmem:[%s1331_s23 + $0x38] sm:$0xff]  ;;  %s1142_s4 = scalar_lea.vmem %s2009_s29, 2048  ;;  %s1230_s5 = smov [#allocation5]  }
  0x34   : > { %v1398_v24 = vsel %vm183_vm1, %v211_v14, %v200_v18  ;;  %v393_v25 = vsub.f32 %v1367_v8, %v1390_v21  ;;  %242 = vrot.lane.b32.xlu1 %v1390_v21, %s1227_s18  ;;  %v1408_v26 = vsel %vm183_vm1, %v215_v12, %v201_v23  ;;  %v1419_v32 = vsel %vm650_vm3, %v642_v15, %v646_v16  ;;  %p1143_p8 = scmp.ne.s32.totalorder %s2009_s29, %s1142_s4  ;;  %s1146_s12 = sshll.u32 %s1230_s5, 4  ;;  %s1147_s12 = int_to_ptr.vmem [resolvable:$false] %s1146_s12 }
  0x35   : > { %v390_v27 = vsub.f32 %v1354_v6, %v1398_v24  ;;  %v399_v29 = vmul.f32 %v391_v22, %v391_v22  ;;  %v392_v30 = vsub.f32 %v1357_v7, %v1408_v26  ;;  %v840_v35 = vsub.f32 %v1354_v6, %v1419_v32  ;;  %s1148_s13 = scalar_lea.vmem %s1147_s12, 4096  ;;  %p1149_p1 = scmp.lt.s32.totalorder %s2009_s29, %s1147_s12 }
  0x36   : > { %v401_v33 = vmul.f32 %v393_v25, %v393_v25  ;;  %v656_v38 = vsel %vm650_vm3, %v647_v28, %v643_v20  ;;  %462 = vrot.lane.b32.xlu0 %v1357_v7, %s1227_s18  ;;  %v1433_v40 = vsel %vm186_vm2, %v666_v19, %v655_v31  ;;  %v670_v41 = vrot.slane %v1367_v8, %v1348_v4  ;;  %p1144_p12 = pnand %p1143_p8, %p1294_p9  ;;  %p1150_p3 = scmp.lt.s32.totalorder %s1148_s13, %s1142_s4 }
  0x37   : > { %v398_v34 = vmul.f32 %v390_v27, %v390_v27  ;;  %v413_v36 = vsel %vm373_vm4, %v399_v29, 0.0  ;;  %v400_v37 = vmul.f32 %v392_v30, %v392_v30  ;;  %v841_v45 = vsub.f32 %v1351_v5, %v1433_v40 }
  0x38   : > { %v414_v39 = vsel %vm373_vm4, %v401_v33, 0.0  ;;  %465 = vrot.lane.b32.xlu1 %v1367_v8, %s1227_s18  ;;  %v1448_v46 = vsel %vm650_vm3, %v643_v20, %v647_v28  ;;  %v848_v48 = vmul.f32 %v840_v35, %v840_v35  ;;  %v1452_v49 = vsel %vm186_vm2, %v670_v41, %v656_v38  ;;  %p1145_p0 = pneg %p1144_p12  ;;  %p1151_p5 = por %p1150_p3, %p1149_p1 }
  0x39   : > { %v406_v44 = vsel %vm373_vm4, %v398_v34, 0.0  ;;  %v415_v47 = vadd.f32 %v414_v39, %v413_v36  ;;  %v842_v50 = vsub.f32 %v1357_v7, %v1448_v46  ;;  %v407_v51 = vsel %vm373_vm4, %v400_v37, 0.0 }
  0x3a   : > { %v843_v52 = vsub.f32 %v1367_v8, %v1452_v49  ;;  %233 = vrot.lane.b32.xlu0 %v1398_v24, %s1227_s18  ;;  %v219_v56 = vrot.slane %v1438_v42, %v1341_v2  ;;  %v648_v58 = vrot.slane %v1441_v43, 1  ;;  %v849_v59 = vmul.f32 %v841_v45, %v841_v45  ;;  %p1152_p6 = pnand %p1151_p5, %p1145_p0 }
  0x3b   : > { %v850_v55 = vmul.f32 %v842_v50, %v842_v50  ;;  %v1471_v60 = vsel %vm195_vm0, %v189_v53, %v193_v54  ;;  %v202_v61 = vsel %vm195_vm0, %v193_v54, %v189_v53  ;;  %v674_v62 = vrot.slane %v1441_v43, %v1348_v4 }
  0x3c   : > { %239 = vrot.lane.b32.xlu1 %v1408_v26, %s1227_s18  ;;  %v851_v9 = vmul.f32 %v843_v52, %v843_v52  ;;  %v395_v10 = vsub.f32 %v1441_v43, %v1471_v60  ;;  %v1484_v11 = vsel %vm183_vm1, %v219_v56, %v202_v61  ;;  %v657_v12 = vsel %vm650_vm3, %v648_v58, %v644_v57 }
  0x3d   : > { %v408_v14 = vadd.f32 %v407_v51, %v406_v44  ;;  %v856_v15 = vsel %vm373_vm4, %v848_v48, 0.0  ;;  %v394_v16 = vsub.f32 %v1438_v42, %v1484_v11  ;;  %v1496_v18 = vsel %vm186_vm2, %v674_v62, %v657_v12 }
  0x3e   : > { %687 = vrot.lane.b32.xlu0 %v1419_v32, %s1227_s18  ;;  %v857_v19 = vsel %vm373_vm4, %v850_v55, 0.0  ;;  %v403_v20 = vmul.f32 %v395_v10, %v395_v10  ;;  %v845_v22 = vsub.f32 %v1441_v43, %v1496_v18  ;;  %v190_v23 = vrot.slane %v1478_v63, 7 }
  0x3f   : > { %v402_v25 = vmul.f32 %v394_v16, %v394_v16  ;;  %v1508_v27 = vsel %vm650_vm3, %v644_v57, %v648_v58  ;;  %v194_v28 = vrot.slane %v1489_v13, 7  ;;  %v223_v29 = vrot.slane %v1478_v63, %v1341_v2 }
  0x40   : > { %690 = vrot.lane.b32.xlu1 %v1433_v40, %s1227_s18  ;;  %v863_v30 = vsel %vm373_vm4, %v849_v59, 0.0  ;;  %v864_v31 = vsel %vm373_vm4, %v851_v9, 0.0  ;;  %v416_v33 = vsel %vm373_vm4, %v403_v20, 0.0  ;;  %v844_v34 = vsub.f32 %v1438_v42, %v1508_v27 }
  0x41   : > { %v853_v35 = vmul.f32 %v845_v22, %v845_v22  ;;  %v1520_v36 = vsel %vm195_vm0, %v190_v23, %v194_v28  ;;  %v203_v37 = vsel %vm195_vm0, %v194_v28, %v190_v23  ;;  %v645_v38 = vrot.slane %v1478_v63, 1 }
  0x42   : > { %v858_v2 = vadd.f32 %v857_v19, %v856_v15  ;;  %693 = vrot.lane.b32.xlu0 %v1448_v46, %s1227_s18  ;;  %v409_v39 = vsel %vm373_vm4, %v402_v25, 0.0  ;;  %v852_v41 = vmul.f32 %v844_v34, %v844_v34  ;;  %v397_v44 = vsub.f32 %v1489_v13, %v1520_v36 }
  0x43   : > { %v417_v45 = vadd.f32 %v416_v33, %v415_v47  ;;  %v1534_v48 = vsel %vm183_vm1, %v223_v29, %v203_v37  ;;  %v649_v50 = vrot.slane %v1489_v13, 1  ;;  %v678_v51 = vrot.slane %v1489_v13, %v1348_v4 }
  0x44   : > { %696 = vrot.lane.b32.xlu1 %v1452_v49, %s1227_s18  ;;  %v865_v52 = vadd.f32 %v864_v31, %v863_v30  ;;  %v859_v53 = vsel %vm373_vm4, %v852_v41, 0.0  ;;  %v405_v54 = vmul.f32 %v397_v44, %v397_v44  ;;  %v396_v55 = vsub.f32 %v1478_v63, %v1534_v48 }
  0x45   : > { %v410_v56 = vadd.f32 %v409_v39, %v408_v14  ;;  %v866_v57 = vsel %vm373_vm4, %v853_v35, 0.0  ;;  %v1546_v47 = vsel %vm650_vm3, %v645_v38, %v649_v50  ;;  %v658_v58 = vsel %vm650_vm3, %v649_v50, %v645_v38 }
  0x46   : > { %245 = vrot.lane.b32.xlu0 %v1484_v11, %s1227_s18  ;;  %v418_v4 = vsel %vm373_vm4, %v405_v54, 0.0  ;;  %v404_v59 = vmul.f32 %v396_v55, %v396_v55  ;;  %v846_v61 = vsub.f32 %v1478_v63, %v1546_v47  ;;  %v1559_v62 = vsel %vm186_vm2, %v678_v51, %v658_v58 }
  0x47   : > { %v860_v9 = vadd.f32 %v859_v53, %v858_v2  ;;  %v419_v10 = vadd.f32 %v418_v4, %v417_v45  ;;  %v847_v1 = vsub.f32 %v1489_v13, %v1559_v62  ;;  %v867_v12 = vadd.f32 %v866_v57, %v865_v52 }
  0x48   : > { %248 = vrot.lane.b32.xlu1 %v1471_v60, %s1227_s18  ;;  %v411_v14 = vsel %vm373_vm4, %v404_v59, 0.0  ;;  %v854_v15 = vmul.f32 %v846_v61, %v846_v61  ;;  %vm232_vm5 = vcmask 1047680  }
  0x49   : > { %1022 = vst.msk [vmem:[%s1564_s25 + $0x18] sm:$0xff] %vm373_vm4, %v419_v10  ;;  %v412_v3 = vadd.f32 %v411_v14, %v410_v56  ;;  %v855_v16 = vmul.f32 %v847_v1, %v847_v1 }
  0x4a   : > { %468 = vrot.lane.b32.xlu0 %v1438_v42, %s1227_s18  ;;  %v861_v19 = vsel %vm373_vm4, %v854_v15, 0.0 }
  0x4b   : > { %1021 = vst.msk [vmem:[%s1564_s25 + $0x10] sm:$0xff] %vm373_vm4, %v412_v3  ;;  %v862_v20 = vadd.f32 %v861_v19, %v860_v9  ;;  %v868_v22 = vsel %vm373_vm4, %v855_v16, 0.0 }
  0x4c   : > { %471 = vrot.lane.b32.xlu1 %v1441_v43, %s1227_s18  ;;  %v869_v23 = vadd.f32 %v868_v22, %v867_v12 }
  0x4d   : > { %1031 = vst.msk [vmem:[%s1564_s25 + $0x60] sm:$0xff] %vm373_vm4, %v862_v20 }
  0x4e   : > { %699 = vrot.lane.b32.xlu0 %v1508_v27, %s1227_s18  ;;  %1032 = vst.msk [vmem:[%s1564_s25 + $0x68] sm:$0xff] %vm373_vm4, %v869_v23 }
  0x50   : > { %702 = vrot.lane.b32.xlu1 %v1496_v18, %s1227_s18 }
  0x52   : > { %251 = vrot.lane.b32.xlu0 %v1534_v48, %s1227_s18 }
  0x54   : > { %254 = vrot.lane.b32.xlu1 %v1520_v36, %s1227_s18 }
  0x56   : > { %474 = vrot.lane.b32.xlu0 %v1478_v63, %s1227_s18 }
  0x58   : > { %477 = vrot.lane.b32.xlu1 %v1489_v13, %s1227_s18 }
  0x5a   : > { %705 = vrot.lane.b32.xlu0 %v1546_v47, %s1227_s18 }
  0x5c   : > { %708 = vrot.lane.b32.xlu1 %v1559_v62, %s1227_s18 }
  0x9f   : > { %v460_v25 = vpop.permute.xlu1 %459  ;;  %v457_v28 = vpop.permute.xlu0 %456 }
  0xa0   : > { %v461_v29 = vsel %vm232_vm5, %v460_v25, %v1351_v5  ;;  %v458_v30 = vsel %vm232_vm5, %v457_v28, %v1354_v6 }
  0xa1   : > { %482 = vrot.lane.b32.xlu0 %v461_v29, %s1227_s18  ;;  %480 = vrot.lane.b32.xlu1 %v458_v30, %s1227_s18 }
  0xa4   : > { %v237_v33 = vpop.permute.xlu0 %236 }
  0xa5   : > { %v238_v14 = vsel %vm232_vm5, %v237_v33, %v1381_v17 }
  0xa6   : > { %v243_v31 = vpop.permute.xlu1 %242 }
  0xa7   : > { %v244_v3 = vsel %vm232_vm5, %v243_v31, %v1390_v21 }
  0xa8   : > { %v463_v35 = vpop.permute.xlu0 %462 }
  0xa9   : > { %v464_v38 = vsel %vm232_vm5, %v463_v35, %v1357_v7 }
  0xaa   : > { %v466_v34 = vpop.permute.xlu1 %465  ;;  %484 = vrot.lane.b32.xlu1 %v464_v38, %s1227_s18 }
  0xab   : > { %v467_v37 = vsel %vm232_vm5, %v466_v34, %v1367_v8 }
  0xac   : > { %486 = vrot.lane.b32.xlu0 %v467_v37, %s1227_s18  ;;  %v234_v39 = vpop.permute.xlu0 %233 }
  0xad   : > { %v235_v16 = vsel %vm232_vm5, %v234_v39, %v1398_v24 }
  0xae   : > { %v240_v2 = vpop.permute.xlu1 %239 }
  0xaf   : > { %v241_v20 = vsel %vm232_vm5, %v240_v2, %v1408_v26 }
  0xb0   : > { %v688_v44 = vpop.permute.xlu0 %687 }
  0xb1   : > { %v689_v22 = vsel %vm232_vm5, %v688_v44, %v1419_v32 }
  0xb2   : > { %v691_v41 = vpop.permute.xlu1 %690 }
  0xb3   : > { %v692_v30 = vsel %vm232_vm5, %v691_v41, %v1433_v40 }
  0xb4   : > { %v694_v50 = vpop.permute.xlu0 %693 }
  0xb5   : > { %v695_v25 = vsel %vm232_vm5, %v694_v50, %v1448_v46 }
  0xb6   : > { %v697_v45 = vpop.permute.xlu1 %696 }
  0xb7   : > { %v698_v34 = vsel %vm232_vm5, %v697_v45, %v1452_v49 }
  0xb8   : > { %v246_v52 = vpop.permute.xlu0 %245 }
  0xb9   : > { %v247_v23 = vsel %vm232_vm5, %v246_v52, %v1484_v11 }
  0xba   : > { %v249_v51 = vpop.permute.xlu1 %248 }
  0xbb   : > { %v250_v19 = vsel %vm232_vm5, %v249_v51, %v1471_v60 }
  0xbc   : > { %v469_v54 = vpop.permute.xlu0 %468 }
  0xbd   : > { %v470_v56 = vsel %vm232_vm5, %v469_v54, %v1438_v42 }
  0xbe   : > { %v472_v53 = vpop.permute.xlu1 %471  ;;  %488 = vrot.lane.b32.xlu1 %v470_v56, %s1227_s18 }
  0xbf   : > { %v473_v55 = vsel %vm232_vm5, %v472_v53, %v1441_v43 }
  0xc0   : > { %490 = vrot.lane.b32.xlu0 %v473_v55, %s1227_s18  ;;  %v700_v58 = vpop.permute.xlu0 %699 }
  0xc1   : > { %v701_v29 = vsel %vm232_vm5, %v700_v58, %v1508_v27 }
  0xc2   : > { %v703_v57 = vpop.permute.xlu1 %702 }
  0xc3   : > { %v704_v37 = vsel %vm232_vm5, %v703_v57, %v1496_v18 }
  0xc4   : > { %v252_v59 = vpop.permute.xlu0 %251 }
  0xc5   : > { %v253_v28 = vsel %vm232_vm5, %v252_v59, %v1534_v48 }
  0xc6   : > { %v255_v4 = vpop.permute.xlu1 %254 }
  0xc7   : > { %v256_v33 = vsel %vm232_vm5, %v255_v4, %v1520_v36 }
  0xc8   : > { %v475_v9 = vpop.permute.xlu0 %474 }
  0xc9   : > { %v476_v1 = vsel %vm232_vm5, %v475_v9, %v1478_v63 }
  0xca   : > { %v478_v61 = vpop.permute.xlu1 %477  ;;  %492 = vrot.lane.b32.xlu0 %v476_v1, %s1227_s18 }
  0xcb   : > { %v479_v10 = vsel %vm232_vm5, %v478_v61, %v1489_v13 }
  0xcc   : > { %494 = vrot.lane.b32.xlu1 %v479_v10, %s1227_s18  ;;  %v706_v12 = vpop.permute.xlu0 %705 }
  0xcd   : > { %v707_v15 = vsel %vm232_vm5, %v706_v12, %v1546_v47 }
  0xce   : > { %723 = vrot.lane.b32.xlu0 %v707_v15, %s1227_s18  ;;  %v709_v31 = vpop.permute.xlu1 %708 }
  0xcf   : > { %v710_v35 = vsel %vm232_vm5, %v709_v31, %v1559_v62 }
  0xd0   : > { %259 = vrot.lane.b32.xlu1 %v238_v14, %s1227_s18 }
  0xd2   : > { %257 = vrot.lane.b32.xlu0 %v235_v16, %s1227_s18 }
  0xd4   : > { %263 = vrot.lane.b32.xlu1 %v244_v3, %s1227_s18 }
  0xd6   : > { %261 = vrot.lane.b32.xlu0 %v241_v20, %s1227_s18 }
  0xd8   : > { %267 = vrot.lane.b32.xlu1 %v250_v19, %s1227_s18 }
  0xda   : > { %265 = vrot.lane.b32.xlu0 %v247_v23, %s1227_s18 }
  0xdc   : > { %711 = vrot.lane.b32.xlu1 %v689_v22, %s1227_s18 }
  0xde   : > { %269 = vrot.lane.b32.xlu0 %v253_v28, %s1227_s18 }
  0xe0   : > { %715 = vrot.lane.b32.xlu1 %v695_v25, %s1227_s18 }
  0xe2   : > { %713 = vrot.lane.b32.xlu0 %v692_v30, %s1227_s18 }
  0xe4   : > { %719 = vrot.lane.b32.xlu1 %v701_v29, %s1227_s18 }
  0xe6   : > { %717 = vrot.lane.b32.xlu0 %v698_v34, %s1227_s18 }
  0xe8   : > { %271 = vrot.lane.b32.xlu1 %v256_v33, %s1227_s18 }
  0xea   : > { %721 = vrot.lane.b32.xlu0 %v704_v37, %s1227_s18 }
  0xec   : > { %725 = vrot.lane.b32.xlu1 %v710_v35, %s1227_s18 }
 0x113   : > { %v483_v38 = vpop.permute.xlu0 %482  ;;  %v481_v2 = vpop.permute.xlu1 %480 }
 0x114   : > { %v497_v39 = vsel %vm232_vm5, %v483_v38, %v1351_v5  ;;  %v496_v41 = vsel %vm232_vm5, %v481_v2, %v1354_v6 }
 0x115   : > { %514 = vrot.lane.b32.xlu0 %v497_v39, %s1228_s26  ;;  %512 = vrot.lane.b32.xlu1 %v496_v41, %s1228_s26 }
 0x11c   : > { %v485_v44 = vpop.permute.xlu1 %484 }
 0x11d   : > { %v498_v50 = vsel %vm232_vm5, %v485_v44, %v1357_v7 }
 0x11e   : > { %v487_v45 = vpop.permute.xlu0 %486  ;;  %516 = vrot.lane.b32.xlu1 %v498_v50, %s1228_s26 }
 0x11f   : > { %v499_v51 = vsel %vm232_vm5, %v487_v45, %v1367_v8 }
 0x120   : > { %518 = vrot.lane.b32.xlu0 %v499_v51, %s1228_s26 }
 0x122   : > { %536 = vrot.lane.b32.xlu1 %v496_v41, %s1229_s27 }
 0x124   : > { %538 = vrot.lane.b32.xlu0 %v497_v39, %s1229_s27 }
 0x126   : > { %540 = vrot.lane.b32.xlu1 %v498_v50, %s1229_s27 }
 0x128   : > { %542 = vrot.lane.b32.xlu0 %v499_v51, %s1229_s27 }
 0x130   : > { %v489_v52 = vpop.permute.xlu1 %488 }
 0x131   : > { %v500_v54 = vsel %vm232_vm5, %v489_v52, %v1438_v42 }
 0x132   : > { %v491_v53 = vpop.permute.xlu0 %490  ;;  %520 = vrot.lane.b32.xlu0 %v500_v54, %s1228_s26 }
 0x133   : > { %v501_v55 = vsel %vm232_vm5, %v491_v53, %v1441_v43 }
 0x134   : > { %522 = vrot.lane.b32.xlu1 %v501_v55, %s1228_s26 }
 0x136   : > { %544 = vrot.lane.b32.xlu0 %v500_v54, %s1229_s27 }
 0x138   : > { %546 = vrot.lane.b32.xlu1 %v501_v55, %s1229_s27 }
 0x13c   : > { %v493_v57 = vpop.permute.xlu0 %492 }
 0x13d   : > { %v502_v4 = vsel %vm232_vm5, %v493_v57, %v1478_v63 }
 0x13e   : > { %v495_v56 = vpop.permute.xlu1 %494  ;;  %524 = vrot.lane.b32.xlu0 %v502_v4, %s1228_s26 }
 0x13f   : > { %v503_v58 = vsel %vm232_vm5, %v495_v56, %v1489_v13 }
 0x140   : > { %526 = vrot.lane.b32.xlu1 %v503_v58, %s1228_s26  ;;  %v724_v15 = vpop.permute.xlu0 %723 }
 0x142   : > { %v260_v59 = vpop.permute.xlu1 %259  ;;  %548 = vrot.lane.b32.xlu0 %v502_v4, %s1229_s27 }
 0x143   : > { %v274_v9 = vsel %vm232_vm5, %v260_v59, %v1381_v17 }
 0x144   : > { %550 = vrot.lane.b32.xlu1 %v503_v58, %s1229_s27  ;;  %v258_v19 = vpop.permute.xlu0 %257 }
 0x146   : > { %v264_v61 = vpop.permute.xlu1 %263 }
 0x147   : > { %v276_v1 = vsel %vm232_vm5, %v264_v61, %v1390_v21 }
 0x148   : > { %293 = vrot.lane.b32.xlu1 %v274_v9, %s1228_s26  ;;  %v262_v22 = vpop.permute.xlu0 %261 }
 0x149   : > { %v275_v25 = vsel %vm232_vm5, %v262_v22, %v1408_v26 }
 0x14a   : > { %v268_v10 = vpop.permute.xlu1 %267 }
 0x14b   : > { %v278_v14 = vsel %vm232_vm5, %v268_v10, %v1471_v60  ;;  %v733_v60 = vsel %vm232_vm5, %v724_v15, %v1546_v47 }
 0x14c   : > { %297 = vrot.lane.b32.xlu1 %v276_v1, %s1228_s26  ;;  %v266_v23 = vpop.permute.xlu0 %265 }
 0x14e   : > { %v712_v12 = vpop.permute.xlu1 %711 }
 0x150   : > { %301 = vrot.lane.b32.xlu1 %v278_v14, %s1228_s26  ;;  %v270_v47 = vpop.permute.xlu0 %269 }
 0x152   : > { %v716_v3 = vpop.permute.xlu1 %715 }
 0x153   : > { %v729_v28 = vsel %vm232_vm5, %v716_v3, %v1448_v46 }
 0x154   : > { %v714_v29 = vpop.permute.xlu0 %713 }
 0x156   : > { %v720_v16 = vpop.permute.xlu1 %719 }
 0x157   : > { %v731_v17 = vsel %vm232_vm5, %v720_v16, %v1508_v27  ;;  %v273_v27 = vsel %vm232_vm5, %v258_v19, %v1398_v24  ;;  %v277_v24 = vsel %vm232_vm5, %v266_v23, %v1484_v11  ;;  %v728_v11 = vsel %vm232_vm5, %v714_v29, %v1433_v40 }
 0x158   : > { %751 = vrot.lane.b32.xlu0 %v731_v17, %s1228_s26  ;;  %v718_v26 = vpop.permute.xlu0 %717 }
 0x159   : > { %v730_v31 = vsel %vm232_vm5, %v718_v26, %v1452_v49 }
 0x15a   : > { %v272_v20 = vpop.permute.xlu1 %271 }
 0x15b   : > { %v280_v21 = vsel %vm232_vm5, %v272_v20, %v1520_v36  ;;  %v727_v36 = vsel %vm232_vm5, %v712_v12, %v1419_v32  ;;  %v279_v32 = vsel %vm232_vm5, %v270_v47, %v1534_v48 }
 0x15c   : > { %305 = vrot.lane.b32.xlu1 %v280_v21, %s1228_s26  ;;  %775 = vrot.lane.b32.xlu0 %v731_v17, %s1229_s27  ;;  %v722_v46 = vpop.permute.xlu0 %721 }
 0x15d   : > { %v732_v48 = vsel %vm232_vm5, %v722_v46, %v1496_v18 }
 0x15e   : > { %v726_v30 = vpop.permute.xlu1 %725 }
 0x15f   : > { %v734_v33 = vsel %vm232_vm5, %v726_v30, %v1559_v62  ;;  %v1765_v62 = vand.u32 127, %v176_v0 }
 0x160   : > { %317 = vrot.lane.b32.xlu1 %v274_v9, %s1229_s27  ;;  %755 = vrot.lane.b32.xlu0 %v733_v60, %s1228_s26 }
 0x161   : > { %vm181_vm6 = vcmp.eq.s32.totalorder %v1765_v62, 0  ;;  %vm182_vm7 = vcmp.eq.s32.totalorder %v1765_v62, 15 }
 0x164   : > { %321 = vrot.lane.b32.xlu1 %v276_v1, %s1229_s27  ;;  %291 = vrot.lane.b32.xlu0 %v273_v27, %s1228_s26 }
 0x168   : > { %743 = vrot.lane.b32.xlu1 %v727_v36, %s1228_s26  ;;  %295 = vrot.lane.b32.xlu0 %v275_v25, %s1228_s26 }
 0x16c   : > { %747 = vrot.lane.b32.xlu1 %v729_v28, %s1228_s26  ;;  %299 = vrot.lane.b32.xlu0 %v277_v24, %s1228_s26 }
 0x170   : > { %767 = vrot.lane.b32.xlu1 %v727_v36, %s1229_s27  ;;  %303 = vrot.lane.b32.xlu0 %v279_v32, %s1228_s26 }
 0x174   : > { %771 = vrot.lane.b32.xlu1 %v729_v28, %s1229_s27  ;;  %315 = vrot.lane.b32.xlu0 %v273_v27, %s1229_s27 }
 0x178   : > { %325 = vrot.lane.b32.xlu1 %v278_v14, %s1229_s27  ;;  %319 = vrot.lane.b32.xlu0 %v275_v25, %s1229_s27 }
 0x17c   : > { %329 = vrot.lane.b32.xlu1 %v280_v21, %s1229_s27  ;;  %323 = vrot.lane.b32.xlu0 %v277_v24, %s1229_s27 }
 0x180   : > { %745 = vrot.lane.b32.xlu0 %v728_v11, %s1228_s26  ;;  %753 = vrot.lane.b32.xlu1 %v732_v48, %s1228_s26 }
 0x184   : > { %749 = vrot.lane.b32.xlu0 %v730_v31, %s1228_s26  ;;  %777 = vrot.lane.b32.xlu1 %v732_v48, %s1229_s27 }
 0x187   : > { %v513_v40 = vpop.permute.xlu1 %512  ;;  %v515_v18 = vpop.permute.xlu0 %514 }
 0x188   : > { %769 = vrot.lane.b32.xlu0 %v728_v11, %s1229_s27  ;;  %757 = vrot.lane.b32.xlu1 %v734_v33, %s1228_s26 }
 0x18c   : > { %773 = vrot.lane.b32.xlu0 %v730_v31, %s1229_s27  ;;  %781 = vrot.lane.b32.xlu1 %v734_v33, %s1229_s27 }
 0x190   : > { %327 = vrot.lane.b32.xlu0 %v279_v32, %s1229_s27  ;;  %v517_v49 = vpop.permute.xlu1 %516 }
 0x192   : > { %v519_v34 = vpop.permute.xlu0 %518 }
 0x194   : > { %779 = vrot.lane.b32.xlu0 %v733_v60, %s1229_s27  ;;  %v537_v35 = vpop.permute.xlu1 %536 }
 0x195   : > { %v560_v44 = vsel %vm181_vm6, %v513_v40, %v537_v35  ;;  %v568_v45 = vsel %vm182_vm7, %v537_v35, %v513_v40 }
 0x196   : > { %v539_v37 = vpop.permute.xlu0 %538  ;;  %v576_v61 = vsub.f32 %v1354_v6, %v560_v44  ;;  %v609_v9 = vsub.f32 %v1354_v6, %v568_v45 }
 0x197   : > { %v561_v50 = vsel %vm181_vm6, %v515_v18, %v539_v37  ;;  %v569_v0 = vsel %vm182_vm7, %v539_v37, %v515_v18 }
 0x198   : > { %v541_v38 = vpop.permute.xlu1 %540  ;;  %v577_v10 = vsub.f32 %v1351_v5, %v561_v50  ;;  %v610_v1 = vsub.f32 %v1351_v5, %v569_v0  ;;  %v584_v21 = vmul.f32 %v576_v61, %v576_v61  ;;  %v617_v60 = vmul.f32 %v609_v9, %v609_v9 }
 0x199   : > { %v562_v51 = vsel %vm181_vm6, %v517_v49, %v541_v38  ;;  %v570_v52 = vsel %vm182_vm7, %v541_v38, %v517_v49 }
 0x19a   : > { %v543_v2 = vpop.permute.xlu0 %542  ;;  %v578_v12 = vsub.f32 %v1357_v7, %v562_v51  ;;  %v611_v14 = vsub.f32 %v1357_v7, %v570_v52  ;;  %v585_v22 = vmul.f32 %v577_v10, %v577_v10  ;;  %v618_v27 = vmul.f32 %v610_v1, %v610_v1 }
 0x19b   : > { %v563_v53 = vsel %vm181_vm6, %v519_v34, %v543_v2  ;;  %v571_v54 = vsel %vm182_vm7, %v543_v2, %v519_v34  ;;  %v592_v11 = vsel %vm373_vm4, %v584_v21, 0.0  ;;  %v625_v48 = vsel %vm373_vm4, %v617_v60, 0.0 }
 0x19c   : > { %v579_v15 = vsub.f32 %v1367_v8, %v563_v53  ;;  %v612_v3 = vsub.f32 %v1367_v8, %v571_v54  ;;  %v586_v23 = vmul.f32 %v578_v12, %v578_v12  ;;  %v619_v36 = vmul.f32 %v611_v14, %v611_v14 }
 0x19d   : > { %v599_v30 = vsel %vm373_vm4, %v585_v22, 0.0  ;;  %v632_v31 = vsel %vm373_vm4, %v618_v27, 0.0 }
 0x19e   : > { %v587_v25 = vmul.f32 %v579_v15, %v579_v15  ;;  %v620_v47 = vmul.f32 %v612_v3, %v612_v3  ;;  %v593_v33 = vsel %vm373_vm4, %v586_v23, 0.0  ;;  %v626_v40 = vsel %vm373_vm4, %v619_v36, 0.0 }
 0x19f   : > { %v594_v54 = vadd.f32 %v593_v33, %v592_v11 }
 0x1a0   : > { %v600_v18 = vsel %vm373_vm4, %v587_v25, 0.0  ;;  %v633_v49 = vsel %vm373_vm4, %v620_v47, 0.0 }
 0x1a4   : > { %v521_v41 = vpop.permute.xlu0 %520 }
 0x1a6   : > { %v523_v39 = vpop.permute.xlu1 %522 }
 0x1a8   : > { %v545_v56 = vpop.permute.xlu0 %544 }
 0x1a9   : > { %v564_v4 = vsel %vm181_vm6, %v521_v41, %v545_v56  ;;  %v572_v59 = vsel %vm182_vm7, %v545_v56, %v521_v41  ;;  %v601_v56 = vadd.f32 %v600_v18, %v599_v30 }
 0x1aa   : > { %v547_v55 = vpop.permute.xlu1 %546  ;;  %v580_v19 = vsub.f32 %v1438_v42, %v564_v4  ;;  %v613_v20 = vsub.f32 %v1438_v42, %v572_v59 }
 0x1ab   : > { %v565_v57 = vsel %vm181_vm6, %v523_v39, %v547_v55  ;;  %v573_v58 = vsel %vm182_vm7, %v547_v55, %v523_v39  ;;  %v627_v55 = vadd.f32 %v626_v40, %v625_v48 }
 0x1ac   : > { %v581_v16 = vsub.f32 %v1441_v43, %v565_v57  ;;  %v614_v17 = vsub.f32 %v1441_v43, %v573_v58  ;;  %v588_v32 = vmul.f32 %v580_v19, %v580_v19  ;;  %v621_v29 = vmul.f32 %v613_v20, %v613_v20 }
 0x1ad   : > { %v634_v57 = vadd.f32 %v633_v49, %v632_v31 }
 0x1ae   : > { %v589_v28 = vmul.f32 %v581_v16, %v581_v16  ;;  %v622_v24 = vmul.f32 %v614_v17, %v614_v17  ;;  %v595_v37 = vsel %vm373_vm4, %v588_v32, 0.0  ;;  %v628_v38 = vsel %vm373_vm4, %v621_v29, 0.0 }
 0x1af   : > { %v596_v1 = vadd.f32 %v595_v37, %v594_v54  ;;  %v629_v12 = vadd.f32 %v628_v38, %v627_v55 }
 0x1b0   : > { %v525_v46 = vpop.permute.xlu0 %524  ;;  %v602_v34 = vsel %vm373_vm4, %v589_v28, 0.0  ;;  %v635_v35 = vsel %vm373_vm4, %v622_v24, 0.0 }
 0x1b1   : > { %v603_v9 = vadd.f32 %v602_v34, %v601_v56  ;;  %v636_v10 = vadd.f32 %v635_v35, %v634_v57 }
 0x1b2   : > { %v527_v26 = vpop.permute.xlu1 %526 }
 0x1b4   : > { %v549_v39 = vpop.permute.xlu0 %548 }
 0x1b5   : > { %v566_v45 = vsel %vm181_vm6, %v525_v46, %v549_v39  ;;  %v574_v50 = vsel %vm182_vm7, %v549_v39, %v525_v46 }
 0x1b6   : > { %v551_v2 = vpop.permute.xlu1 %550  ;;  %v582_v52 = vsub.f32 %v1478_v63, %v566_v45  ;;  %v615_v53 = vsub.f32 %v1478_v63, %v574_v50 }
 0x1b7   : > { %v567_v41 = vsel %vm181_vm6, %v527_v26, %v551_v2  ;;  %v575_v44 = vsel %vm182_vm7, %v551_v2, %v527_v26 }
 0x1b8   : > { %v583_v0 = vsub.f32 %v1489_v13, %v567_v41  ;;  %v616_v51 = vsub.f32 %v1489_v13, %v575_v44  ;;  %v590_v59 = vmul.f32 %v582_v52, %v582_v52  ;;  %v623_v61 = vmul.f32 %v615_v53, %v615_v53 }
 0x1ba   : > { %v591_v58 = vmul.f32 %v583_v0, %v583_v0  ;;  %v624_v4 = vmul.f32 %v616_v51, %v616_v51  ;;  %v597_v3 = vsel %vm373_vm4, %v590_v59, 0.0  ;;  %v630_v16 = vsel %vm373_vm4, %v623_v61, 0.0  ;;  %v294_v60 = vpop.permute.xlu1 %293 }
 0x1bb   : > { %v598_v20 = vadd.f32 %v597_v3, %v596_v1  ;;  %v631_v21 = vadd.f32 %v630_v16, %v629_v12 }
 0x1bc   : > { %v604_v14 = vsel %vm373_vm4, %v591_v58, 0.0  ;;  %v637_v15 = vsel %vm373_vm4, %v624_v4, 0.0 }
 0x1bd   : > { %v605_v17 = vadd.f32 %v604_v14, %v603_v9  ;;  %v638_v19 = vadd.f32 %v637_v15, %v636_v10  ;;  %1025 = vst.msk [vmem:[%s1564_s25 + $0x30] sm:$0xff] %vm373_vm4, %v598_v20  ;;  %1027 = vst.msk [vmem:[%s1564_s25 + $0x40] sm:$0xff] %vm373_vm4, %v631_v21 }
 0x1be   : > { %v298_v22 = vpop.permute.xlu1 %297 }
 0x1bf   : > { %1026 = vst.msk [vmem:[%s1564_s25 + $0x38] sm:$0xff] %vm373_vm4, %v605_v17  ;;  %1028 = vst.msk [vmem:[%s1564_s25 + $0x48] sm:$0xff] %vm373_vm4, %v638_v19 }
 0x1c2   : > { %v302_v27 = vpop.permute.xlu1 %301 }
 0x1ca   : > { %v752_v23 = vpop.permute.xlu0 %751 }
 0x1ce   : > { %v306_v36 = vpop.permute.xlu1 %305  ;;  %v776_v25 = vpop.permute.xlu0 %775 }
 0x1cf   : > { %v803_v50 = vsel %vm182_vm7, %v776_v25, %v752_v23 }
 0x1d0   : > { %v877_v59 = vsub.f32 %v1438_v42, %v803_v50 }
 0x1d2   : > { %v318_v47 = vpop.permute.xlu1 %317  ;;  %v1841_v28 = vpop.permute.xlu0 %755 }
 0x1d3   : > { %v340_v31 = vsel %vm181_vm6, %v294_v60, %v318_v47  ;;  %v350_v33 = vsel %vm182_vm7, %v318_v47, %v294_v60 }
 0x1d4   : > { %v358_v35 = vsub.f32 %v1351_v5, %v340_v31  ;;  %v424_v37 = vsub.f32 %v1351_v5, %v350_v33 }
 0x1d6   : > { %v322_v24 = vpop.permute.xlu1 %321  ;;  %v1843_v32 = vpop.permute.xlu0 %291  ;;  %v366_v0 = vmul.f32 %v358_v35, %v358_v35  ;;  %v432_v51 = vmul.f32 %v424_v37, %v424_v37 }
 0x1d7   : > { %v342_v46 = vsel %vm181_vm6, %v298_v22, %v322_v24  ;;  %v352_v11 = vsel %vm182_vm7, %v322_v24, %v298_v22 }
 0x1d8   : > { %v360_v40 = vsub.f32 %v1367_v8, %v342_v46  ;;  %v426_v18 = vsub.f32 %v1367_v8, %v352_v11  ;;  %v795_v8 = vsel %vm181_vm6, %v752_v23, %v776_v25  ;;  %v381_v10 = vsel %vm373_vm4, %v366_v0, 0.0 }
 0x1d9   : > { %v811_v4 = vsub.f32 %v1438_v42, %v795_v8  ;;  %v446_v1 = vsel %vm373_vm4, %v432_v51, 0.0 }
 0x1da   : > { %v744_v29 = vpop.permute.xlu1 %743  ;;  %v296_v26 = vpop.permute.xlu0 %295  ;;  %v368_v38 = vmul.f32 %v360_v40, %v360_v40  ;;  %v434_v2 = vmul.f32 %v426_v18, %v426_v18 }
 0x1dc   : > { %v382_v5 = vsel %vm373_vm4, %v368_v38, 0.0  ;;  %v447_v52 = vsel %vm373_vm4, %v434_v2, 0.0 }
 0x1dd   : > { %v383_v15 = vadd.f32 %v382_v5, %v381_v10  ;;  %v448_v3 = vadd.f32 %v447_v52, %v446_v1 }
 0x1de   : > { %v748_v48 = vpop.permute.xlu1 %747  ;;  %v300_v30 = vpop.permute.xlu0 %299 }
 0x1e2   : > { %v768_v49 = vpop.permute.xlu1 %767  ;;  %v1855_v34 = vpop.permute.xlu0 %303 }
 0x1e3   : > { %v791_v44 = vsel %vm181_vm6, %v744_v29, %v768_v49  ;;  %v799_v45 = vsel %vm182_vm7, %v768_v49, %v744_v29 }
 0x1e4   : > { %v807_v53 = vsub.f32 %v1354_v6, %v791_v44  ;;  %v873_v54 = vsub.f32 %v1354_v6, %v799_v45 }
 0x1e6   : > { %v772_v39 = vpop.permute.xlu1 %771  ;;  %v316_v41 = vpop.permute.xlu0 %315  ;;  %v815_v19 = vmul.f32 %v807_v53, %v807_v53  ;;  %v881_v20 = vmul.f32 %v873_v54, %v873_v54 }
 0x1e7   : > { %v793_v55 = vsel %vm181_vm6, %v748_v48, %v772_v39  ;;  %v801_v56 = vsel %vm182_vm7, %v772_v39, %v748_v48  ;;  %v349_v40 = vsel %vm182_vm7, %v316_v41, %v1843_v32 }
 0x1e8   : > { %v809_v16 = vsub.f32 %v1357_v7, %v793_v55  ;;  %v875_v17 = vsub.f32 %v1357_v7, %v801_v56 }
 0x1ea   : > { %v326_v57 = vpop.permute.xlu1 %325  ;;  %v320_v58 = vpop.permute.xlu0 %319  ;;  %v817_v31 = vmul.f32 %v809_v16, %v809_v16  ;;  %v883_v33 = vmul.f32 %v875_v17, %v875_v17 }
 0x1eb   : > { %v344_v61 = vsel %vm181_vm6, %v302_v27, %v326_v57  ;;  %v354_v9 = vsel %vm182_vm7, %v326_v57, %v302_v27  ;;  %v341_v23 = vsel %vm181_vm6, %v296_v26, %v320_v58  ;;  %v351_v25 = vsel %vm182_vm7, %v320_v58, %v296_v26 }
 0x1ec   : > { %v362_v12 = vsub.f32 %v1441_v43, %v344_v61  ;;  %v428_v14 = vsub.f32 %v1441_v43, %v354_v9  ;;  %v339_v26 = vsel %vm181_vm6, %v1843_v32, %v316_v41  ;;  %v359_v44 = vsub.f32 %v1357_v7, %v341_v23 }
 0x1ed   : > { %v425_v45 = vsub.f32 %v1357_v7, %v351_v25  ;;  %v357_v32 = vsub.f32 %v1354_v6, %v339_v26  ;;  %v423_v41 = vsub.f32 %v1354_v6, %v349_v40  ;;  %v824_v54 = vsel %vm373_vm4, %v817_v31, 0.0 }
 0x1ee   : > { %v370_v21 = vmul.f32 %v362_v12, %v362_v12  ;;  %v436_v60 = vmul.f32 %v428_v14, %v428_v14  ;;  %v330_v22 = vpop.permute.xlu1 %329  ;;  %v324_v27 = vpop.permute.xlu0 %323  ;;  %v890_v7 = vsel %vm373_vm4, %v883_v33, 0.0  ;;  %v367_v55 = vmul.f32 %v359_v44, %v359_v44 }
 0x1ef   : > { %v346_v47 = vsel %vm181_vm6, %v306_v36, %v330_v22  ;;  %v356_v24 = vsel %vm182_vm7, %v330_v22, %v306_v36  ;;  %v343_v49 = vsel %vm181_vm6, %v300_v30, %v324_v27  ;;  %v353_v35 = vsel %vm182_vm7, %v324_v27, %v300_v30  ;;  %v1111_v22 = vld [vmem:[%s1331_s23 + $0x8] sm:$0xff] }
 0x1f0   : > { %v384_v29 = vsel %vm373_vm4, %v370_v21, 0.0  ;;  %v449_v46 = vsel %vm373_vm4, %v436_v60, 0.0  ;;  %v364_v11 = vsub.f32 %v1489_v13, %v346_v47  ;;  %v430_v48 = vsub.f32 %v1489_v13, %v356_v24 }
 0x1f1   : > { %v385_v2 = vadd.f32 %v384_v29, %v383_v15  ;;  %v450_v39 = vadd.f32 %v449_v46, %v448_v3  ;;  %v361_v51 = vsub.f32 %v1438_v42, %v343_v49  ;;  %v427_v5 = vsub.f32 %v1438_v42, %v353_v35 }
 0x1f2   : > { %v372_v18 = vmul.f32 %v364_v11, %v364_v11  ;;  %v438_v36 = vmul.f32 %v430_v48, %v430_v48  ;;  %v754_v37 = vpop.permute.xlu1 %753  ;;  %v746_v38 = vpop.permute.xlu0 %745  ;;  %v433_v56 = vmul.f32 %v425_v45, %v425_v45  ;;  %v1923_v6 = vmul.f32 %v811_v4, %v811_v4 }
 0x1f3   : > { %v1925_v57 = vmul.f32 %v877_v59, %v877_v59  ;;  %v365_v58 = vmul.f32 %v357_v32, %v357_v32  ;;  %v431_v61 = vmul.f32 %v423_v41, %v423_v41  ;;  %v823_v42 = vsel %vm373_vm4, %v815_v19, 0.0 }
 0x1f4   : > { %v386_v8 = vsel %vm373_vm4, %v372_v18, 0.0  ;;  %v451_v50 = vsel %vm373_vm4, %v438_v36, 0.0  ;;  %v889_v9 = vsel %vm373_vm4, %v881_v20, 0.0  ;;  %v369_v10 = vmul.f32 %v361_v51, %v361_v51 }
 0x1f5   : > { %v387_v0 = vadd.f32 %v386_v8, %v385_v2  ;;  %v452_v30 = vadd.f32 %v451_v50, %v450_v39  ;;  %v435_v1 = vmul.f32 %v427_v5, %v427_v5  ;;  %v1929_v12 = vadd.f32 %v824_v54, %v823_v42 }
 0x1f6   : > { %v778_v52 = vpop.permute.xlu1 %777  ;;  %v750_v53 = vpop.permute.xlu0 %749  ;;  %v1931_v14 = vadd.f32 %v890_v7, %v889_v9  ;;  %v375_v16 = vsel %vm373_vm4, %v367_v55, 0.0  ;;  %v440_v17 = vsel %vm373_vm4, %v433_v56, 0.0  ;;  %v374_v21 = vsel %vm373_vm4, %v365_v58, 0.0 }
 0x1f7   : > { %389 = vst.msk [vmem:[%s1564_s25 + $0x8] sm:$0xff] %vm373_vm4, %v387_v0  ;;  %1024 = vst.msk [vmem:[%s1564_s25 + $0x28] sm:$0xff] %vm373_vm4, %v452_v30  ;;  %v796_v15 = vsel %vm181_vm6, %v754_v37, %v778_v52  ;;  %v804_v4 = vsel %vm182_vm7, %v778_v52, %v754_v37  ;;  %v439_v60 = vsel %vm373_vm4, %v431_v61, 0.0  ;;  %v377_v25 = vsel %vm373_vm4, %v369_v10, 0.0  ;;  %v1112_v37 = vld [vmem:[%s1331_s23 + $0x18] sm:$0xff] }
 0x1f8   : > { %v442_v47 = vsel %vm373_vm4, %v435_v1, 0.0  ;;  %v812_v24 = vsub.f32 %v1441_v43, %v796_v15  ;;  %v878_v29 = vsub.f32 %v1441_v43, %v804_v4  ;;  %v376_v46 = vadd.f32 %v375_v16, %v374_v21 }
 0x1f9   : > { %v441_v11 = vadd.f32 %v440_v17, %v439_v60  ;;  %v826_v62 = vsel %vm373_vm4, %v1923_v6, 0.0 }
 0x1fa   : > { %v770_v59 = vpop.permute.xlu0 %769  ;;  %v758_v3 = vpop.permute.xlu1 %757  ;;  %v378_v35 = vadd.f32 %v377_v25, %v376_v46  ;;  %v820_v39 = vmul.f32 %v812_v24, %v812_v24  ;;  %v886_v44 = vmul.f32 %v878_v29, %v878_v29  ;;  %v827_v24 = vadd.f32 %v826_v62, %v1929_v12 }
 0x1fb   : > { %v792_v19 = vsel %vm181_vm6, %v746_v38, %v770_v59  ;;  %v800_v20 = vsel %vm182_vm7, %v770_v59, %v746_v38  ;;  %v443_v43 = vadd.f32 %v442_v47, %v441_v11 }
 0x1fc   : > { %v808_v27 = vsub.f32 %v1111_v22, %v792_v19  ;;  %v874_v23 = vsub.f32 %v1111_v22, %v800_v20  ;;  %v833_v56 = vsel %vm373_vm4, %v820_v39, 0.0  ;;  %v899_v58 = vsel %vm373_vm4, %v886_v44, 0.0  ;;  %v1113_v19 = vld [vmem:[%s1331_s23 + $0x30] sm:$0xff] }
 0x1fe   : > { %v816_v48 = vmul.f32 %v808_v27, %v808_v27  ;;  %v882_v31 = vmul.f32 %v874_v23, %v874_v23  ;;  %v774_v33 = vpop.permute.xlu0 %773  ;;  %v782_v26 = vpop.permute.xlu1 %781 }
 0x1ff   : > { %v794_v40 = vsel %vm181_vm6, %v750_v53, %v774_v33  ;;  %v802_v18 = vsel %vm182_vm7, %v774_v33, %v750_v53  ;;  %v798_v36 = vsel %vm181_vm6, %v758_v3, %v782_v26  ;;  %v806_v49 = vsel %vm182_vm7, %v782_v26, %v758_v3 }
 0x200   : > { %v810_v38 = vsub.f32 %v1112_v37, %v794_v40  ;;  %v876_v2 = vsub.f32 %v1112_v37, %v802_v18  ;;  %v814_v45 = vsub.f32 %v1489_v13, %v798_v36  ;;  %v880_v32 = vsub.f32 %v1489_v13, %v806_v49 }
 0x201   : > { %v830_v41 = vsel %vm373_vm4, %v816_v48, 0.0  ;;  %v896_v8 = vsel %vm373_vm4, %v882_v31, 0.0 }
 0x202   : > { %v818_v50 = vmul.f32 %v810_v38, %v810_v38  ;;  %v884_v0 = vmul.f32 %v876_v2, %v876_v2  ;;  %v328_v30 = vpop.permute.xlu0 %327  ;;  %v822_v51 = vmul.f32 %v814_v45, %v814_v45  ;;  %v888_v5 = vmul.f32 %v880_v32, %v880_v32 }
 0x203   : > { %v345_v52 = vsel %vm181_vm6, %v1855_v34, %v328_v30  ;;  %v355_v53 = vsel %vm182_vm7, %v328_v30, %v1855_v34 }
 0x204   : > { %v831_v54 = vsel %vm373_vm4, %v818_v50, 0.0  ;;  %v897_v13 = vsel %vm373_vm4, %v884_v0, 0.0  ;;  %v363_v7 = vsub.f32 %v1478_v63, %v345_v52  ;;  %v429_v55 = vsub.f32 %v1478_v63, %v355_v53 }
 0x205   : > { %v832_v61 = vadd.f32 %v831_v54, %v830_v41  ;;  %v898_v42 = vadd.f32 %v897_v13, %v896_v8  ;;  %v835_v9 = vsel %vm373_vm4, %v822_v51, 0.0  ;;  %v901_v10 = vsel %vm373_vm4, %v888_v5, 0.0 }
 0x206   : > { %v371_v34 = vmul.f32 %v363_v7, %v363_v7  ;;  %v437_v1 = vmul.f32 %v429_v55, %v429_v55  ;;  %v780_v15 = vpop.permute.xlu0 %779 }
 0x207   : > { %v834_v4 = vadd.f32 %v833_v56, %v832_v61  ;;  %v900_v59 = vadd.f32 %v899_v58, %v898_v42  ;;  %v797_v63 = vsel %vm181_vm6, %v1841_v28, %v780_v15  ;;  %v805_v3 = vsel %vm182_vm7, %v780_v15, %v1841_v28 }
 0x208   : > { %v379_v16 = vsel %vm373_vm4, %v371_v34, 0.0  ;;  %v444_v17 = vsel %vm373_vm4, %v437_v1, 0.0  ;;  %v813_v20 = vsub.f32 %v1113_v19, %v797_v63  ;;  %v879_v21 = vsub.f32 %v1113_v19, %v805_v3 }
 0x209   : > { %v836_v60 = vadd.f32 %v835_v9, %v834_v4  ;;  %v902_v22 = vadd.f32 %v901_v10, %v900_v59  ;;  %v380_v27 = vadd.f32 %v379_v16, %v378_v35  ;;  %v445_v23 = vadd.f32 %v444_v17, %v443_v43 }
 0x20a   : > { %v892_v28 = vsel %vm373_vm4, %v1925_v57, 0.0  ;;  %v821_v25 = vmul.f32 %v813_v20, %v813_v20  ;;  %v887_v47 = vmul.f32 %v879_v21, %v879_v21 }
 0x20b   : > { %1030 = vst.msk [vmem:[%s1564_s25 + $0x58] sm:$0xff] %vm373_vm4, %v836_v60  ;;  %1034 = vst.msk [vmem:[%s1564_s25 + $0x78] sm:$0xff] %vm373_vm4, %v902_v22  ;;  %v893_v6 = vadd.f32 %v892_v28, %v1931_v14 }
 0x20c   : > { %388 = vst.msk [vmem:[%s1564_s25] sm:$0xff] %vm373_vm4, %v380_v27  ;;  %1023 = vst.msk [vmem:[%s1564_s25 + $0x20] sm:$0xff] %vm373_vm4, %v445_v23  ;;  %v828_v29 = vsel %vm373_vm4, %v821_v25, 0.0  ;;  %v894_v57 = vsel %vm373_vm4, %v887_v47, 0.0 }
 0x20d   : > { %v829_v46 = vadd.f32 %v828_v29, %v827_v24  ;;  %v895_v11 = vadd.f32 %v894_v57, %v893_v6 }
 0x20f   : > { %1029 = vst.msk [vmem:[%s1564_s25 + $0x50] sm:$0xff] %vm373_vm4, %v829_v46  ;;  %1033 = vst.msk [vmem:[%s1564_s25 + $0x70] sm:$0xff] %vm373_vm4, %v895_v11 }
 0x210   : > { %1155 = shalt.err (!%p1152_p6)
}
 0x211   : > { %s1156_s15 = scalar_lea.hbm %s2007_s2, 2048  ;;  %s1160_s23 = scalar_lea.hbm %s2062_s1, 4096 }
 0x212   : > { %p1157_p7 = scmp.ne.s32.totalorder %s2007_s2, %s1156_s15  ;;  %p1161_p13 = scmp.lt.s32.totalorder %s2007_s2, %s2062_s1 }
 0x213   : > { %p1162_p2 = scmp.lt.s32.totalorder %s1160_s23, %s1156_s15 }
 0x214   : > { %p1158_p10 = pnand %p1157_p7, %p1294_p9 }
 0x215   : > { %p1163_p8 = por %p1162_p2, %p1161_p13 }
 0x216   : > { %p1159_p4 = pneg %p1158_p10 }
 0x218   : > { %p1164_p12 = pnand %p1163_p8, %p1159_p4 }
 0x21a   : > { %1167 = shalt.err (!%p1164_p12)
}
 0x21b   : > { %s1231_s25 = smov 128   ;;  %s1232_s26 = smov 8  }
 0x21c   : > { %1044 = dma.vmem_to_hbm [thread:$0]  (%p1294_p9), %s2009_s29, 2048, %s2007_s2, %s907_s3, %s1231_s25, %s1231_s25, %s1232_s26  }
 0x21d PF: > { %s937_s27 = sand.u32 1, %s1202_s6   ;;  %p2068_p0 = scmp.ge.s32.totalorder %s1222_s11, 2 }
 0x21e   : > { %s938_s28 = scalar_lea.sflag [#allocation4], %s937_s27 }
 0x21f   : > { %p1051_p1 = pnand %p2068_p0, %p1301_p11 }
 0x221   : > { %p1052_p3 = pneg %p1051_p1 }
 0x223   : > { %1197 = dma.done.wait (%p1052_p3), %s938_s28, 2048  }
 0x224   : > { %1199 = vsyncadd (%p1052_p3), %s938_s28, 4294965248  ;;  %s17_s11 = sadd.s32 1, %s1222_s11   ;;  %s2069_s6 = smov %s1206_s7 }
 0x225   : > { %p14_p5 = scmp.ge.s32.totalorder %s17_s11, 4   ;;  %s2070_s7 = smov %s1210_s8 }
 0x226   : > { %s2071_s8 = smov %s1299_s20  ;;  %s2072_s9 = smov %s1218_s10 }
 0x227   : > { %s2073_s10 = smov %s2075_s14  ;;  %16 = sbr.rel (!%p14_p5) target bundleno = 6 (0x6), region = 76 }
 0x22c   :  { %943 = vsyncpa [#allocation3], 1 }
 0x22d   :  { %945 = vsyncpa [#allocation3 + $0x1], 1 }
 0x22e   :  { %946 = vsyncpa [#allocation4], 1 }
 0x22f   :  { %948 = vsyncpa [#allocation4 + $0x1], 1 }

</bundles_post_ra>
